<compile_context>
chip_gen: v6e
topology: v6e:2x2x1
jax: 0.10.0
libtpu: 0.0.40
codegen_flags: <defaults>
</compile_context>

<pallas_src>
import functools

import jax
import jax.numpy as jnp
from jax.experimental import pallas as pl
from jax.experimental.pallas import tpu as pltpu


def _round_up(x, m):
    return ((x + m - 1) // m) * m


def _gcn_fused_kernel(x_ref, adj_ref, w1_ref, b1_ref, w2_ref, b2_ref,
                      o_ref, sup1_ref, h_ref, sup2_ref, *, tm):
    """Fused 2-layer GCN.

    Grid = (phase, row_tile).  phase 0: build h (hidden activations) tile by
    tile into VMEM scratch.  phase 1: out[rows_i] = adj[rows_i,:] @ (h@W2) + b2.
    The dense [tile, N] slab of adj for the current row tile is the only
    operand that changes per grid step; x / W1 / W2 / biases use constant
    block indices so they are DMA'd once and stay resident.
    """
    phase = pl.program_id(0)   # 0 -> gc1 (+ReLU), 1 -> gc2
    i = pl.program_id(1)       # node-row tile index
    row0 = pl.multiple_of(i * tm, tm)

    # -- phase 0, first tile: support1 = x @ W1 for the whole graph ----------
    @pl.when(jnp.logical_and(phase == 0, i == 0))
    def _():
        sup1_ref[...] = jnp.dot(
            x_ref[...], w1_ref[...], preferred_element_type=jnp.float32
        ).astype(sup1_ref.dtype)

    # -- phase 0: h[rows_i] = relu(adj[rows_i, :] @ support1 + b1) -----------
    @pl.when(phase == 0)
    def _():
        acc = jnp.dot(adj_ref[...], sup1_ref[...],
                      preferred_element_type=jnp.float32)
        h = jnp.maximum(acc + b1_ref[...], 0.0)
        h_ref[pl.ds(row0, tm), :] = h.astype(h_ref.dtype)
        # This output block is revisited (and fully overwritten) in phase 1;
        # write zeros so the intermediate writeback is deterministic.
        o_ref[...] = jnp.zeros_like(o_ref)

    # -- phase 1, first tile: support2 = h @ W2 for the whole graph ----------
    @pl.when(jnp.logical_and(phase == 1, i == 0))
    def _():
        sup2_ref[...] = jnp.dot(
            h_ref[...], w2_ref[...], preferred_element_type=jnp.float32
        ).astype(sup2_ref.dtype)

    # -- phase 1: out[rows_i] = adj[rows_i, :] @ support2 + b2 ---------------
    @pl.when(phase == 1)
    def _():
        acc = jnp.dot(adj_ref[...], sup2_ref[...],
                      preferred_element_type=jnp.float32)
        o_ref[...] = (acc + b2_ref[...]).astype(o_ref.dtype)


@jax.jit
def gcn_forward(x, adj, params, dropout_rate):
    """Full GCN forward (inference mode: dropout is identity)."""
    w1, b1, w2, b2 = params
    n, nfeat = x.shape
    nhid = w1.shape[1]
    nclass = w2.shape[1]

    # ---- padded, lane-dense / MXU-aligned shapes ----------------------------
    if n <= 256:
        n_p = _round_up(n, 8)
        tm = n_p                      # single row tile
    else:
        tm = 256
        n_p = _round_up(n, tm)
    f_p = _round_up(nfeat, 128)
    h_p = _round_up(nhid, 128)
    c_p = _round_up(nclass, 128)
    num_row_tiles = n_p // tm

    # Zero-pad + cast MXU operands to bf16 (zeros in padded rows/cols keep the
    # math exact; padded output rows/cols are sliced off below).
    bf16 = jnp.bfloat16
    x_p = jnp.zeros((n_p, f_p), bf16).at[:n, :nfeat].set(x.astype(bf16))
    adj_p = jnp.zeros((n_p, n_p), bf16).at[:n, :n].set(adj.astype(bf16))
    w1_p = jnp.zeros((f_p, h_p), bf16).at[:nfeat, :nhid].set(w1.astype(bf16))
    w2_p = jnp.zeros((h_p, c_p), bf16).at[:nhid, :nclass].set(w2.astype(bf16))
    b1_p = jnp.zeros((1, h_p), jnp.float32).at[0, :nhid].set(b1.astype(jnp.float32))
    b2_p = jnp.zeros((1, c_p), jnp.float32).at[0, :nclass].set(b2.astype(jnp.float32))

    kernel = functools.partial(_gcn_fused_kernel, tm=tm)

    out_p = pl.pallas_call(
        kernel,
        out_shape=jax.ShapeDtypeStruct((n_p, c_p), jnp.float32),
        grid=(2, num_row_tiles),                      # (phase, row tile)
        in_specs=[
            pl.BlockSpec((n_p, f_p), lambda j, i: (0, 0)),   # x      (resident)
            pl.BlockSpec((tm, n_p), lambda j, i: (i, 0)),    # adj row tile
            pl.BlockSpec((f_p, h_p), lambda j, i: (0, 0)),   # W1     (resident)
            pl.BlockSpec((1, h_p), lambda j, i: (0, 0)),     # b1
            pl.BlockSpec((h_p, c_p), lambda j, i: (0, 0)),   # W2     (resident)
            pl.BlockSpec((1, c_p), lambda j, i: (0, 0)),     # b2
        ],
        out_specs=pl.BlockSpec((tm, c_p), lambda j, i: (i, 0)),
        scratch_shapes=[
            pltpu.VMEM((n_p, h_p), bf16),   # support1 = x @ W1
            pltpu.VMEM((n_p, h_p), bf16),   # h = relu(adj @ support1 + b1)
            pltpu.VMEM((n_p, c_p), bf16),   # support2 = h @ W2
        ],
        compiler_params=pltpu.CompilerParams(
            # phase 1 depends on all phase-0 tiles (through the h scratch), so
            # both axes must stay sequential.
            dimension_semantics=("arbitrary", "arbitrary"),
            vmem_limit_bytes=32 * 1024 * 1024,
        ),
    )(x_p, adj_p, w1_p, b1_p, w2_p, b2_p)

    # F.dropout(..., training=False) -> identity at inference.
    # TODO(synk): training-mode dropout would use pltpu.prng_seed/prng_random_bits.
    del dropout_rate
    return out_p[:n, :nclass]


def init_params(key, nfeat, nhid, nclass):
    """Deterministic parameter init (uniform, like GraphConv.reset_parameters)."""
    k1, k2, k3, k4 = jax.random.split(key, 4)
    std1 = 1.0 / jnp.sqrt(nhid)
    std2 = 1.0 / jnp.sqrt(nclass)
    w1 = jax.random.uniform(k1, (nfeat, nhid), jnp.float32, -std1, std1)
    b1 = jax.random.uniform(k2, (nhid,), jnp.float32, -std1, std1)
    w2 = jax.random.uniform(k3, (nhid, nclass), jnp.float32, -std2, std2)
    b2 = jax.random.uniform(k4, (nclass,), jnp.float32, -std2, std2)
    return w1, b1, w2, b2


if __name__ == "__main__":
    # Small synthetic graph: N nodes, nfeat input features.
    N, nfeat, nhid, nclass = 16, 32, 32, 8
    dropout = 0.5

    key = jax.random.PRNGKey(0)
    kx, ka, kp = jax.random.split(key, 3)

    x = jax.random.normal(kx, (N, nfeat), jnp.float32)

    # Dense symmetric-normalized adjacency with self-loops.
    a_raw = (jax.random.uniform(ka, (N, N)) > 0.7).astype(jnp.float32)
    a_sym = jnp.clip(a_raw + a_raw.T, 0.0, 1.0) + jnp.eye(N, dtype=jnp.float32)
    deg = jnp.sum(a_sym, axis=1)
    d_inv_sqrt = 1.0 / jnp.sqrt(deg)
    adj = a_sym * d_inv_sqrt[:, None] * d_inv_sqrt[None, :]

    params = init_params(kp, nfeat, nhid, nclass)

    out = gcn_forward(x, adj, params, dropout)
    jax.block_until_ready(out)
    assert out.shape == (N, nclass)

    w1, b1, w2, b2 = params

    # Reference 1: pure f32 math (loose tolerance -- kernel uses bf16 MXU inputs).
    h_ref = jnp.maximum(adj @ (x @ w1) + b1, 0.0)
    out_ref_f32 = adj @ (h_ref @ w2) + b2
    assert jnp.allclose(out, out_ref_f32, atol=1e-1, rtol=1e-1), (
        float(jnp.max(jnp.abs(out - out_ref_f32))))

    # Reference 2: mimic the kernel's bf16 input/intermediate quantization with
    # f32 accumulation (tight tolerance).
    def bf16r(a):
        return a.astype(jnp.bfloat16).astype(jnp.float32)

    xb, adjb, w1b, w2b = bf16r(x), bf16r(adj), bf16r(w1), bf16r(w2)
    sup1_q = bf16r(xb @ w1b)
    h_q = bf16r(jnp.maximum(adjb @ sup1_q + b1, 0.0))
    sup2_q = bf16r(h_q @ w2b)
    out_ref_q = adjb @ sup2_q + b2
    assert jnp.allclose(out, out_ref_q, atol=1e-2, rtol=1e-2), (
        float(jnp.max(jnp.abs(out - out_ref_q))))

    print("KERNEL_OK")
</pallas_src>

<mosaic_0001>
module attributes {stable_mosaic.version = 11 : i64} {
  func.func @_gcn_fused_kernel(%arg0: i32, %arg1: i32, %arg2: memref<16x128xbf16, #tpu.memory_space<vmem>>, %arg3: memref<16x16xbf16, #tpu.memory_space<vmem>>, %arg4: memref<128x128xbf16, #tpu.memory_space<vmem>>, %arg5: memref<1x128xf32, #tpu.memory_space<vmem>>, %arg6: memref<128x128xbf16, #tpu.memory_space<vmem>>, %arg7: memref<1x128xf32, #tpu.memory_space<vmem>>, %arg8: memref<16x128xf32, #tpu.memory_space<vmem>>, %arg9: memref<16x128xbf16, #tpu.memory_space<vmem>>, %arg10: memref<16x128xbf16, #tpu.memory_space<vmem>>, %arg11: memref<16x128xbf16, #tpu.memory_space<vmem>>) attributes {dimension_semantics = [#tpu.dimension_semantics<arbitrary>, #tpu.dimension_semantics<arbitrary>], iteration_bounds = array<i64: 2, 1>, scalar_prefetch = 0 : i64, scratch_operands = 3 : i64, tpu.core_type = #tpu.core_type<tc>, window_params = [{pipeline_mode = #tpu.pipeline_mode<synchronous>, transform_indices = @transform_0, window_bounds = array<i64: 16, 128>}, {transform_indices = @transform_1, window_bounds = array<i64: 16, 16>}, {pipeline_mode = #tpu.pipeline_mode<synchronous>, transform_indices = @transform_2, window_bounds = array<i64: 128, 128>}, {pipeline_mode = #tpu.pipeline_mode<synchronous>, transform_indices = @transform_3, window_bounds = array<i64: 1, 128>}, {pipeline_mode = #tpu.pipeline_mode<synchronous>, transform_indices = @transform_4, window_bounds = array<i64: 128, 128>}, {pipeline_mode = #tpu.pipeline_mode<synchronous>, transform_indices = @transform_5, window_bounds = array<i64: 1, 128>}, {transform_indices = @transform_6, window_bounds = array<i64: 16, 128>}]} {
    %c16_i32 = arith.constant 16 : i32
    %0 = arith.muli %arg1, %c16_i32 : i32
    %1 = tpu.assume_multiple %0, 16 : i32
    %c0_i32 = arith.constant 0 : i32
    %2 = arith.cmpi eq, %arg0, %c0_i32 : i32
    %c0_i32_0 = arith.constant 0 : i32
    %3 = arith.cmpi eq, %arg1, %c0_i32_0 : i32
    %4 = arith.andi %2, %3 : i1
    %5 = arith.extui %4 : i1 to i32
    %c0_i32_1 = arith.constant 0 : i32
    %6 = arith.cmpi ne, %5, %c0_i32_1 : i32
    scf.if %6 {
      %c0 = arith.constant 0 : index
      %c0_8 = arith.constant 0 : index
      %18 = vector.load %arg2[%c0, %c0_8] : memref<16x128xbf16, #tpu.memory_space<vmem>>, vector<16x128xbf16>
      %c0_9 = arith.constant 0 : index
      %c0_10 = arith.constant 0 : index
      %19 = vector.load %arg4[%c0_9, %c0_10] : memref<128x128xbf16, #tpu.memory_space<vmem>>, vector<128x128xbf16>
      %cst = arith.constant dense<0.000000e+00> : vector<16x128xf32>
      %20 = tpu.matmul %18, %19, %cst {dimension_numbers = #tpu.dot_dimension_numbers<[1], [0], [0], [1], [0, 0, 1, 1], [], []>} : vector<16x128xbf16>, vector<128x128xbf16>, vector<16x128xf32> -> vector<16x128xf32>
      %21 = arith.truncf %20 : vector<16x128xf32> to vector<16x128xbf16>
      %c0_11 = arith.constant 0 : index
      %c0_12 = arith.constant 0 : index
      %22 = vector.load %arg9[%c0_11, %c0_12] : memref<16x128xbf16, #tpu.memory_space<vmem>>, vector<16x128xbf16>
      tpu.vector_store %arg9[%c0_11, %c0_12], %21 {strides = array<i32>} : memref<16x128xbf16, #tpu.memory_space<vmem>>, vector<16x128xbf16>,
    } else {
    }
    %c0_i32_2 = arith.constant 0 : i32
    %7 = arith.cmpi eq, %arg0, %c0_i32_2 : i32
    %8 = arith.extui %7 : i1 to i32
    %c0_i32_3 = arith.constant 0 : i32
    %9 = arith.cmpi ne, %8, %c0_i32_3 : i32
    scf.if %9 {
      %c0 = arith.constant 0 : index
      %c0_8 = arith.constant 0 : index
      %18 = vector.load %arg3[%c0, %c0_8] : memref<16x16xbf16, #tpu.memory_space<vmem>>, vector<16x16xbf16>
      %c0_9 = arith.constant 0 : index
      %c0_10 = arith.constant 0 : index
      %19 = vector.load %arg9[%c0_9, %c0_10] : memref<16x128xbf16, #tpu.memory_space<vmem>>, vector<16x128xbf16>
      %cst = arith.constant dense<0.000000e+00> : vector<16x128xf32>
      %20 = tpu.matmul %18, %19, %cst {dimension_numbers = #tpu.dot_dimension_numbers<[1], [0], [0], [1], [0, 0, 1, 1], [], []>} : vector<16x16xbf16>, vector<16x128xbf16>, vector<16x128xf32> -> vector<16x128xf32>
      %c0_11 = arith.constant 0 : index
      %c0_12 = arith.constant 0 : index
      %21 = vector.load %arg5[%c0_11, %c0_12] : memref<1x128xf32, #tpu.memory_space<vmem>>, vector<1x128xf32>
      %22 = vector.broadcast %21 : vector<1x128xf32> to vector<16x128xf32>
      %23 = arith.addf %20, %22 : vector<16x128xf32>
      %cst_13 = arith.constant 0.000000e+00 : f32
      %24 = vector.broadcast %cst_13 : f32 to vector<16x128xf32>
      %25 = arith.maximumf %23, %24 : vector<16x128xf32>
      %26 = arith.truncf %25 : vector<16x128xf32> to vector<16x128xbf16>
      %27 = arith.index_cast %1 : i32 to index
      %c0_14 = arith.constant 0 : index
      %28 = vector.load %arg10[%27, %c0_14] : memref<16x128xbf16, #tpu.memory_space<vmem>>, vector<16x128xbf16>
      tpu.vector_store %arg10[%27, %c0_14], %26 {strides = array<i32>} : memref<16x128xbf16, #tpu.memory_space<vmem>>, vector<16x128xbf16>,
      %cst_15 = arith.constant 0.000000e+00 : f32
      %29 = vector.broadcast %cst_15 : f32 to vector<16x128xf32>
      %c0_16 = arith.constant 0 : index
      %c0_17 = arith.constant 0 : index
      %30 = vector.load %arg8[%c0_16, %c0_17] : memref<16x128xf32, #tpu.memory_space<vmem>>, vector<16x128xf32>
      tpu.vector_store %arg8[%c0_16, %c0_17], %29 {strides = array<i32>} : memref<16x128xf32, #tpu.memory_space<vmem>>, vector<16x128xf32>,
    } else {
    }
    %c1_i32 = arith.constant 1 : i32
    %10 = arith.cmpi eq, %arg0, %c1_i32 : i32
    %c0_i32_4 = arith.constant 0 : i32
    %11 = arith.cmpi eq, %arg1, %c0_i32_4 : i32
    %12 = arith.andi %10, %11 : i1
    %13 = arith.extui %12 : i1 to i32
    %c0_i32_5 = arith.constant 0 : i32
    %14 = arith.cmpi ne, %13, %c0_i32_5 : i32
    scf.if %14 {
      %c0 = arith.constant 0 : index
      %c0_8 = arith.constant 0 : index
      %18 = vector.load %arg10[%c0, %c0_8] : memref<16x128xbf16, #tpu.memory_space<vmem>>, vector<16x128xbf16>
      %c0_9 = arith.constant 0 : index
      %c0_10 = arith.constant 0 : index
      %19 = vector.load %arg6[%c0_9, %c0_10] : memref<128x128xbf16, #tpu.memory_space<vmem>>, vector<128x128xbf16>
      %cst = arith.constant dense<0.000000e+00> : vector<16x128xf32>
      %20 = tpu.matmul %18, %19, %cst {dimension_numbers = #tpu.dot_dimension_numbers<[1], [0], [0], [1], [0, 0, 1, 1], [], []>} : vector<16x128xbf16>, vector<128x128xbf16>, vector<16x128xf32> -> vector<16x128xf32>
      %21 = arith.truncf %20 : vector<16x128xf32> to vector<16x128xbf16>
      %c0_11 = arith.constant 0 : index
      %c0_12 = arith.constant 0 : index
      %22 = vector.load %arg11[%c0_11, %c0_12] : memref<16x128xbf16, #tpu.memory_space<vmem>>, vector<16x128xbf16>
      tpu.vector_store %arg11[%c0_11, %c0_12], %21 {strides = array<i32>} : memref<16x128xbf16, #tpu.memory_space<vmem>>, vector<16x128xbf16>,
    } else {
    }
    %c1_i32_6 = arith.constant 1 : i32
    %15 = arith.cmpi eq, %arg0, %c1_i32_6 : i32
    %16 = arith.extui %15 : i1 to i32
    %c0_i32_7 = arith.constant 0 : i32
    %17 = arith.cmpi ne, %16, %c0_i32_7 : i32
    scf.if %17 {
      %c0 = arith.constant 0 : index
      %c0_8 = arith.constant 0 : index
      %18 = vector.load %arg3[%c0, %c0_8] : memref<16x16xbf16, #tpu.memory_space<vmem>>, vector<16x16xbf16>
      %c0_9 = arith.constant 0 : index
      %c0_10 = arith.constant 0 : index
      %19 = vector.load %arg11[%c0_9, %c0_10] : memref<16x128xbf16, #tpu.memory_space<vmem>>, vector<16x128xbf16>
      %cst = arith.constant dense<0.000000e+00> : vector<16x128xf32>
      %20 = tpu.matmul %18, %19, %cst {dimension_numbers = #tpu.dot_dimension_numbers<[1], [0], [0], [1], [0, 0, 1, 1], [], []>} : vector<16x16xbf16>, vector<16x128xbf16>, vector<16x128xf32> -> vector<16x128xf32>
      %c0_11 = arith.constant 0 : index
      %c0_12 = arith.constant 0 : index
      %21 = vector.load %arg7[%c0_11, %c0_12] : memref<1x128xf32, #tpu.memory_space<vmem>>, vector<1x128xf32>
      %22 = vector.broadcast %21 : vector<1x128xf32> to vector<16x128xf32>
      %23 = arith.addf %20, %22 : vector<16x128xf32>
      %c0_13 = arith.constant 0 : index
      %c0_14 = arith.constant 0 : index
      %24 = vector.load %arg8[%c0_13, %c0_14] : memref<16x128xf32, #tpu.memory_space<vmem>>, vector<16x128xf32>
      tpu.vector_store %arg8[%c0_13, %c0_14], %23 {strides = array<i32>} : memref<16x128xf32, #tpu.memory_space<vmem>>, vector<16x128xf32>,
    } else {
    }
    return
  }
  func.func @transform_0(%arg0: i32, %arg1: i32) -> (i32, i32) {
    %c0_i32 = arith.constant 0 : i32
    %c0_i32_0 = arith.constant 0 : i32
    %c0_i32_1 = arith.constant 0 : i32
    return %c0_i32, %c0_i32_0 : i32, i32
  }
  func.func @transform_1(%arg0: i32, %arg1: i32) -> (i32, i32) {
    %c0_i32 = arith.constant 0 : i32
    %c0_i32_0 = arith.constant 0 : i32
    return %arg1, %c0_i32 : i32, i32
  }
  func.func @transform_2(%arg0: i32, %arg1: i32) -> (i32, i32) {
    %c0_i32 = arith.constant 0 : i32
    %c0_i32_0 = arith.constant 0 : i32
    %c0_i32_1 = arith.constant 0 : i32
    return %c0_i32, %c0_i32_0 : i32, i32
  }
  func.func @transform_3(%arg0: i32, %arg1: i32) -> (i32, i32) {
    %c0_i32 = arith.constant 0 : i32
    %c0_i32_0 = arith.constant 0 : i32
    %c0_i32_1 = arith.constant 0 : i32
    return %c0_i32, %c0_i32_0 : i32, i32
  }
  func.func @transform_4(%arg0: i32, %arg1: i32) -> (i32, i32) {
    %c0_i32 = arith.constant 0 : i32
    %c0_i32_0 = arith.constant 0 : i32
    %c0_i32_1 = arith.constant 0 : i32
    return %c0_i32, %c0_i32_0 : i32, i32
  }
  func.func @transform_5(%arg0: i32, %arg1: i32) -> (i32, i32) {
    %c0_i32 = arith.constant 0 : i32
    %c0_i32_0 = arith.constant 0 : i32
    %c0_i32_1 = arith.constant 0 : i32
    return %c0_i32, %c0_i32_0 : i32, i32
  }
  func.func @transform_6(%arg0: i32, %arg1: i32) -> (i32, i32) {
    %c0_i32 = arith.constant 0 : i32
    %c0_i32_0 = arith.constant 0 : i32
    return %arg1, %c0_i32 : i32, i32
  }
}

</mosaic_0001>

<bundles_post_ra>
// kernel: gcn_forward.1
= control target key start
LH: loop header
LB: loop body
LE: loop exit
PB: predicated region body
PF: predicated region fallthrough
CT: control target
= control target key end

     0   :  { %s1015_s21 = smov 0   ;;  %s1017_s22 = smov 0   ;;  %s1123_s0 = inlined_call_operand.vmem [shape: bf16[16,128], index: 0, kind: input, shape index: {}]   ;;  %s1124_s1 = inlined_call_operand.vmem [shape: bf16[16,16], index: 1, kind: input, shape index: {}]   ;;  %s1125_s2 = inlined_call_operand.vmem [shape: bf16[128,128], index: 2, kind: input, shape index: {}]   ;;  %s1126_s3 = inlined_call_operand.vmem [shape: f32[1,128], index: 3, kind: input, shape index: {}]   ;;  %s1127_s4 = inlined_call_operand.vmem [shape: bf16[128,128], index: 4, kind: input, shape index: {}]   ;;  %s1128_s5 = inlined_call_operand.vmem [shape: f32[1,128], index: 5, kind: input, shape index: {}]   ;;  %s1129_s6 = inlined_call_operand.vmem [shape: f32[16,128], index: 6, kind: output, shape index: {}]  }
   0x1   :  { %s1019_s23 = smov 0  }
   0x2 LB: > { %s28_s24 = sadd.s32 1, %s966_s22  ;;  %p756_p0 = scmp.ge.s32.totalorder %s970_s23, 1  ;;  %s970_s23 = sphi %s1019_s23, %s16_s23   ;;  %s966_s22 = sphi %s1017_s22, %s1131_s22   ;;  %s962_s21 = sphi %s1015_s21, %s1130_s21  }
   0x3   : > { %p30_p1 = scmp.ge.s32.totalorder %s28_s24, 2  ;;  %p225_p2 = scmp.lt.s32.totalorder %s970_s23, 3 }
   0x5   : > { %s1133_s24 = smov (%p30_p1, %s28_s24), 0  ;;  %p226_p3 = pnand %p756_p0, %p225_p2 }
   0x6   : > { %p269_p4 = scmp.eq.s32.totalorder (!%p226_p3), %s962_s21, 0 }
   0x7   : > { %229 = sbr.rel (%p226_p3) target bundleno = 907 (0x38b), region = 44 }
   0xc   : > { %274 = sbr.rel (!%p269_p4) target bundleno = 245 (0xf5), region = 48  ;;  %v926_v0 = vld [vmem:[%s1125_s2 + $0x38] sm:$0xff] (%p269_p4)   ;;  %v972_v1 = vmov (%p269_p4), 0.0   ;;  %v927_v2 = vld [vmem:[%s1125_s2 + $0x30] sm:$0xff] (%p269_p4)   ;;  %vm973_vm0 = vmmov (%p269_p4), 0   ;;  %v928_v3 = vld [vmem:[%s1125_s2 + $0x28] sm:$0xff] (%p269_p4)  }
   0xd   : > { %842 = vmatprep.subr.bf16.mxu0 (%p269_p4), %v972_v1  ;;  %858 = vmatprep.mubr.msk.bf16.mxu0 (%p269_p4), %vm973_vm0, %v972_v1  ;;  %v929_v4 = vld [vmem:[%s1125_s2 + $0x20] sm:$0xff] (%p269_p4)   ;;  %v930_v5 = vld [vmem:[%s1125_s2 + $0x18] sm:$0xff] (%p269_p4)   ;;  %v931_v6 = vld [vmem:[%s1125_s2 + $0x10] sm:$0xff] (%p269_p4)  }
   0xe   : > { %843 = vmatpush3.bf16.msra.mxu0 (%p269_p4), %v926_v0  ;;  %v932_v7 = vld [vmem:[%s1125_s2 + $0x8] sm:$0xff] (%p269_p4)   ;;  %v933_v8 = vld [vmem:[%s1125_s2] sm:$0xff] (%p269_p4)  }
   0xf   : > { %844 = vmatprep.subr.bf16.mxu0 (%p269_p4), %v972_v1  ;;  %v934_v9 = vld [vmem:[%s1123_s0] sm:$0xff] (%p269_p4)  }
  0x12   : > { %845 = vmatpush3.bf16.msra.mxu0 %v927_v2 }
  0x13   : > { %846 = vmatprep.subr.bf16.mxu0 %v972_v1 }
  0x16   : > { %847 = vmatpush3.bf16.msra.mxu0 %v928_v3 }
  0x17   : > { %848 = vmatprep.subr.bf16.mxu0 %v972_v1 }
  0x1a   : > { %849 = vmatpush3.bf16.msra.mxu0 %v929_v4 }
  0x1b   : > { %850 = vmatprep.subr.bf16.mxu0 %v972_v1 }
  0x1e   : > { %851 = vmatpush3.bf16.msra.mxu0 %v930_v5 }
  0x1f   : > { %852 = vmatprep.subr.bf16.mxu0 %v972_v1 }
  0x22   : > { %853 = vmatpush3.bf16.msra.mxu0 %v931_v6 }
  0x23   : > { %854 = vmatprep.subr.bf16.mxu0 %v972_v1 }
  0x26   : > { %855 = vmatpush3.bf16.msra.mxu0 %v932_v7 }
  0x27   : > { %856 = vmatprep.subr.bf16.mxu0 %v972_v1 }
  0x2a   : > { %857 = vmatpush3.bf16.msra.mxu0 %v933_v8 }
  0x2d   : > { %859 = vmatmul.mubr.bf16.vlgmr.msra.gmra.mxu0 %v934_v9 }
  0xed   : > { %v381_v10 = vpop.f32.mrf.mxu0 }
  0xef   : > { %v860_v11 = vpop.f32.mrf.mxu0 }
  0xf1   : > { %v384_v12 = vpop.f32.mrf.mxu0 }
  0xf2   : > { %v808_v13 = vpack.c.bf16 %v384_v12, %v381_v10 }
  0xf3   : > { %v861_v14 = vpop.f32.mrf.mxu0 }
  0xf4   : > { %809 = vst [vmem:[#allocation2] sm:$0xff] %v808_v13  }
  0xf5 PF: > { %p769_p5 = scmp.ne.s32.totalorder %s962_s21, 0 }
  0xf7   : > { %400 = sbr.rel (%p769_p5) target bundleno = 461 (0x1cd), region = 52 }
  0xfc   : > { %v935_v15 = vld [vmem:[#allocation2] sm:$0xff]   ;;  %v974_v16 = vmov 0.0   ;;  %vm975_vm1 = vmmov 0   ;;  %vm423_vm2 = vcmask 130048  }
  0xfd   : > { %862 = vmatprep.subr.bf16.mxu0 %v974_v16  ;;  %484 = vst [vmem:[%s1129_s6] sm:$0xff] %v974_v16  ;;  %485 = vst [vmem:[%s1129_s6 + $0x8] sm:$0xff] %v974_v16  ;;  %v936_v17 = vld [vmem:[%s1124_s1] sm:$0xff]   ;;  %864 = vmatprep.mubr.msk.bf16.mxu0 %vm975_vm1, %v974_v16 }
  0xfe   : > { %863 = vmatpush3.bf16.msra.mxu0 %v935_v15  ;;  %v770_v18 = vld [vmem:[%s1126_s3] ss:$0 sm:$0xff] }
 0x101   : > { %865 = vmatmul.mubr.msk.bf16.vlgmr.msra.gmra.mxu0 %vm423_vm2, %v936_v17 }
 0x1c1   : > { %v461_v19 = vpop.f32.mrf.mxu0 }
 0x1c2   : > { %v462_v21 = vadd.f32 %v770_v18, %v461_v19 }
 0x1c3   : > { %v866_v20 = vpop.f32.mrf.mxu0 }
 0x1c4   : > { %v468_v25 = vmax.f32 %v462_v21, 0.0 }
 0x1c5   : > { %v464_v22 = vpop.f32.mrf.mxu0 }
 0x1c6   : > { %v465_v23 = vadd.f32 %v770_v18, %v464_v22 }
 0x1c7   : > { %v867_v24 = vpop.f32.mrf.mxu0 }
 0x1c8   : > { %v469_v26 = vmax.f32 %v465_v23, 0.0 }
 0x1ca   : > { %v813_v27 = vpack.c.bf16 %v469_v26, %v468_v25 }
 0x1cc   : > { %814 = vst [vmem:[#allocation3] sm:$0xff] %v813_v27  }
 0x1cd PF: > { %p486_p6 = scmp.eq.s32.totalorder %s962_s21, 1 }
 0x1ce   : > { %v937_v28 = vld [vmem:[%s1127_s4 + $0x38] sm:$0xff] (%p486_p6)   ;;  %v976_v29 = vmov (%p486_p6), 0.0   ;;  %v938_v30 = vld [vmem:[%s1127_s4 + $0x30] sm:$0xff] (%p486_p6)   ;;  %vm977_vm3 = vmmov (%p486_p6), 0   ;;  %v939_v31 = vld [vmem:[%s1127_s4 + $0x28] sm:$0xff] (%p486_p6)  }
 0x1cf   : > { %490 = sbr.rel (!%p486_p6) target bundleno = 695 (0x2b7), region = 56  ;;  %868 = vmatprep.subr.bf16.mxu0 (%p486_p6), %v976_v29  ;;  %884 = vmatprep.mubr.msk.bf16.mxu0 (%p486_p6), %vm977_vm3, %v976_v29  ;;  %v940_v32 = vld [vmem:[%s1127_s4 + $0x20] sm:$0xff] (%p486_p6)   ;;  %v941_v33 = vld [vmem:[%s1127_s4 + $0x18] sm:$0xff] (%p486_p6)   ;;  %v942_v34 = vld [vmem:[%s1127_s4 + $0x10] sm:$0xff] (%p486_p6)  }
 0x1d0   : > { %869 = vmatpush3.bf16.msra.mxu0 (%p486_p6), %v937_v28  ;;  %v943_v35 = vld [vmem:[%s1127_s4 + $0x8] sm:$0xff] (%p486_p6)   ;;  %v944_v36 = vld [vmem:[%s1127_s4] sm:$0xff] (%p486_p6)  }
 0x1d1   : > { %870 = vmatprep.subr.bf16.mxu0 (%p486_p6), %v976_v29 }
 0x1d3   : > { %v945_v37 = vld [vmem:[#allocation3] sm:$0xff] (%p486_p6)  }
 0x1d4   : > { %871 = vmatpush3.bf16.msra.mxu0 %v938_v30 }
 0x1d5   : > { %872 = vmatprep.subr.bf16.mxu0 %v976_v29 }
 0x1d8   : > { %873 = vmatpush3.bf16.msra.mxu0 %v939_v31 }
 0x1d9   : > { %874 = vmatprep.subr.bf16.mxu0 %v976_v29 }
 0x1dc   : > { %875 = vmatpush3.bf16.msra.mxu0 %v940_v32 }
 0x1dd   : > { %876 = vmatprep.subr.bf16.mxu0 %v976_v29 }
 0x1e0   : > { %877 = vmatpush3.bf16.msra.mxu0 %v941_v33 }
 0x1e1   : > { %878 = vmatprep.subr.bf16.mxu0 %v976_v29 }
 0x1e4   : > { %879 = vmatpush3.bf16.msra.mxu0 %v942_v34 }
 0x1e5   : > { %880 = vmatprep.subr.bf16.mxu0 %v976_v29 }
 0x1e8   : > { %881 = vmatpush3.bf16.msra.mxu0 %v943_v35 }
 0x1e9   : > { %882 = vmatprep.subr.bf16.mxu0 %v976_v29 }
 0x1ec   : > { %883 = vmatpush3.bf16.msra.mxu0 %v944_v36 }
 0x1ef   : > { %885 = vmatmul.mubr.bf16.vlgmr.msra.gmra.mxu0 %v945_v37 }
 0x2af   : > { %v597_v38 = vpop.f32.mrf.mxu0 }
 0x2b1   : > { %v886_v39 = vpop.f32.mrf.mxu0 }
 0x2b3   : > { %v600_v40 = vpop.f32.mrf.mxu0 }
 0x2b4   : > { %v818_v41 = vpack.c.bf16 %v600_v40, %v597_v38 }
 0x2b5   : > { %v887_v42 = vpop.f32.mrf.mxu0 }
 0x2b6   : > { %819 = vst [vmem:[#allocation4] sm:$0xff] %v818_v41  }
 0x2b7 PF: > { %p788_p7 = scmp.ne.s32.totalorder %s962_s21, 1 }
 0x2b9   : > { %616 = sbr.rel (%p788_p7) target bundleno = 907 (0x38b), region = 60 }
 0x2be   : > { %v946_v43 = vld [vmem:[#allocation4] sm:$0xff]   ;;  %v978_v44 = vmov 0.0   ;;  %v947_v45 = vld [vmem:[%s1124_s1] sm:$0xff]   ;;  %vm979_vm4 = vmmov 0   ;;  %vm639_vm5 = vcmask 130048  }
 0x2bf   : > { %888 = vmatprep.subr.bf16.mxu0 %v978_v44  ;;  %890 = vmatprep.mubr.msk.bf16.mxu0 %vm979_vm4, %v978_v44  ;;  %v789_v46 = vld [vmem:[%s1128_s5] ss:$0 sm:$0xff] }
 0x2c0   : > { %889 = vmatpush3.bf16.msra.mxu0 %v946_v43 }
 0x2c3   : > { %891 = vmatmul.mubr.msk.bf16.vlgmr.msra.gmra.mxu0 %vm639_vm5, %v947_v45 }
 0x383   : > { %v677_v47 = vpop.f32.mrf.mxu0 }
 0x384   : > { %v678_v48 = vadd.f32 %v789_v46, %v677_v47 }
 0x385   : > { %v892_v49 = vpop.f32.mrf.mxu0 }
 0x386   : > { %684 = vst [vmem:[%s1129_s6] sm:$0xff] %v678_v48 }
 0x387   : > { %v680_v50 = vpop.f32.mrf.mxu0 }
 0x388   : > { %v681_v51 = vadd.f32 %v789_v46, %v680_v50 }
 0x389   : > { %v893_v52 = vpop.f32.mrf.mxu0 }
 0x38a   : > { %685 = vst [vmem:[%s1129_s6 + $0x8] sm:$0xff] %v681_v51 }
 0x38b PF: > { %s16_s23 = sadd.s32 1, %s970_s23   ;;  %s1130_s21 = smov %s966_s22 }
 0x38c   : > { %p13_p8 = scmp.ge.s32.totalorder %s16_s23, 4   ;;  %s1131_s22 = smov %s1133_s24 }
 0x38e   :  { %15 = sbr.rel (!%p13_p8) target bundleno = 2 (0x2), region = 91 }

</bundles_post_ra>
